<compile_context>
chip_gen: v6e
topology: v6e:2x2x1
jax: 0.10.0
libtpu: 0.0.40
codegen_flags: <defaults>
</compile_context>

<pallas_src>
import functools

import jax
import jax.numpy as jnp
import numpy as np
from jax.experimental import pallas as pl
from jax.experimental.pallas import tpu as pltpu


def _rnn_kernel(x_ref, p_ref, hc_ref, bout_ref, y_ref, *,
                seq_len, batch_pad, hidden, d_in, r_ih, r_hh, r_b, r_out):
    S, Bp, H, D = seq_len, batch_pad, hidden, d_in
    f32, bf16 = jnp.float32, jnp.bfloat16

    # ---- One-time weight loads / bf16 casts (off the serial recurrence). ----
    w_emb = p_ref[0:D, :].astype(bf16)            # (D, 4H)  cols >= E are zero
    b_emb = p_ref[D:D + 1, :]                     # (1, 4H)  f32
    w_ih = p_ref[r_ih:r_hh, :].astype(bf16)       # (4H, 4H) rows >= E are zero
    w_hh = p_ref[r_hh:r_hh + H, :].astype(bf16)   # (H, 4H)  g-gate cols x2
    b_g = p_ref[r_b:r_b + 1, :]                   # (1, 4H)  f32, g-gate x2
    w_out = p_ref[r_out:r_out + H, :][:, 0:1]     # (H, 1)   f32

    # ---- Hoisted, time-independent pass: all timesteps' gate pre-acts. ----
    #   emb = relu(X @ W_emb + b_emb)                     (S*Bp, 4H) [E cols live]
    #   xg  = emb @ W_ih + (b_ih + b_hh)                  (S*Bp, 4H)
    x = x_ref[...].astype(bf16)
    emb = jnp.maximum(
        jnp.dot(x, w_emb, preferred_element_type=f32) + b_emb, 0.0)
    xg = jnp.dot(emb.astype(bf16), w_ih, preferred_element_type=f32) + b_g

    # ---- Serial recurrence: fully unrolled, every slice static & aligned. ----
    h = hc_ref[0:Bp, :]                           # (Bp, H) f32
    c = hc_ref[Bp:2 * Bp, :]
    hs = []
    for t in range(S):
        row = t * Bp                              # static, 8-row aligned
        gates = xg[row:row + Bp, :] + jnp.dot(
            h.astype(bf16), w_hh, preferred_element_type=f32)     # (Bp, 4H)
        # Single EUP sigmoid over the whole tile; g-gate tanh recovered as
        # 2*sigmoid(2z) - 1 (the x2 lives in the packed weights).
        # PyTorch LSTM gate ordering: [i, f, g, o].
        sig = jax.nn.sigmoid(gates)
        i_g = sig[:, 0 * H:1 * H]
        f_g = sig[:, 1 * H:2 * H]
        g_g = 2.0 * sig[:, 2 * H:3 * H] - 1.0
        o_g = sig[:, 3 * H:4 * H]
        c = f_g * c + i_g * g_g
        h = o_g * jnp.tanh(c)
        hs.append(h)                              # stays in vregs (no store)

    # ---- Deferred head: one (S*Bp, H) @ (H, 1) matmul + sigmoid + store. ----
    hs_all = jnp.concatenate(hs, axis=0)          # (S*Bp, H)
    y = jax.nn.sigmoid(
        jnp.dot(hs_all, w_out, preferred_element_type=f32) + bout_ref[0])
    y_ref[...] = y.astype(y_ref.dtype)


def _pack_params(params, *, D, E, H):
    """Pack all weights/biases into one (rows, 4H) f32 buffer (single DMA).

    The x2 of tanh(z) = 2*sigmoid(2z) - 1 is folded into the g-gate columns
    of W_ih / W_hh / b_lstm here.
    """
    G = 4 * H
    r_ih = -(-(D + 1) // 8) * 8       # W_emb rows + b_emb row, padded to 8
    r_hh = r_ih + G                   # W_ih padded to G rows (matches emb width)
    r_b = r_hh + H
    r_out = r_b + 8
    rows = r_out + (-(-H // 8)) * 8

    scale = np.ones((G,), np.float32)
    scale[2 * H:3 * H] = 2.0          # g-gate pre-activation x2

    P = np.zeros((rows, G), np.float32)
    P[0:D, 0:E] = np.asarray(params["w_emb"], np.float32)
    P[D, 0:E] = np.asarray(params["b_emb"], np.float32).reshape(-1)
    P[r_ih:r_ih + E, :] = np.asarray(params["w_ih"], np.float32) * scale
    P[r_hh:r_hh + H, :] = np.asarray(params["w_hh"], np.float32) * scale
    P[r_b, :] = np.asarray(params["b_lstm"], np.float32).reshape(-1) * scale
    P[r_out:r_out + H, 0] = np.asarray(params["w_out"], np.float32).reshape(-1)
    return jnp.asarray(P), dict(r_ih=r_ih, r_hh=r_hh, r_b=r_b, r_out=r_out)


def make_forward(params):
    """Returns a jitted forward(prev_window, h0, c0) -> (seq, batch, 1)."""
    D, E = params["w_emb"].shape
    H = params["w_hh"].shape[0]
    assert 4 * H == 128, "kernel assumes 4*hidden_dim == 128 lanes"

    packed, lay = _pack_params(params, D=D, E=E, H=H)
    b_out = jnp.asarray(params["b_out"], jnp.float32).reshape(1)
    Bp = 8                                        # pad batch to a full sublane tile

    @jax.jit
    def forward(prev_window, h0, c0):
        B, S, Din = prev_window.shape
        assert B <= Bp

        # Time-major, batch zero-padded to 8: row t*Bp + b.  Fused by XLA into
        # one small copy (no separately dispatched transpose op).
        x = jnp.transpose(prev_window, (1, 0, 2))             # (S, B, D)
        x = jnp.pad(x, ((0, 0), (0, Bp - B), (0, 0))).reshape(S * Bp, Din)
        hc = jnp.concatenate(
            [jnp.pad(h0, ((0, Bp - B), (0, 0))),
             jnp.pad(c0, ((0, Bp - B), (0, 0)))], axis=0)      # (2*Bp, H)

        kernel = functools.partial(
            _rnn_kernel, seq_len=S, batch_pad=Bp, hidden=H, d_in=Din,
            r_ih=lay["r_ih"], r_hh=lay["r_hh"], r_b=lay["r_b"],
            r_out=lay["r_out"])

        y = pl.pallas_call(
            kernel,
            out_shape=jax.ShapeDtypeStruct((S * Bp, 1), jnp.float32),
            in_specs=[
                pl.BlockSpec(memory_space=pltpu.MemorySpace.VMEM),   # x
                pl.BlockSpec(memory_space=pltpu.MemorySpace.VMEM),   # packed W/b
                pl.BlockSpec(memory_space=pltpu.MemorySpace.VMEM),   # h0 | c0
                pl.BlockSpec(memory_space=pltpu.MemorySpace.SMEM),   # b_out (1,)
            ],
            out_specs=pl.BlockSpec(memory_space=pltpu.MemorySpace.VMEM),
        )(x, packed, hc, b_out)

        # (S*Bp, 1) -> (S, B, 1): drop padded batch rows.
        return y.reshape(S, Bp, 1)[:, :B, :]

    return forward


def _reference_forward(prev_window, params, h0, c0):
    """Pure-JAX f32 reference mirroring the PyTorch forward (eval mode)."""
    x = jnp.transpose(prev_window, (1, 0, 2))                    # (S, B, D)
    emb = jnp.maximum(x @ params["w_emb"] + params["b_emb"], 0.0)  # (S, B, E)
    H = h0.shape[1]
    h, c = h0, c0
    hs = []
    for t in range(x.shape[0]):
        gates = emb[t] @ params["w_ih"] + h @ params["w_hh"] + params["b_lstm"]
        i_g = jax.nn.sigmoid(gates[:, 0 * H:1 * H])
        f_g = jax.nn.sigmoid(gates[:, 1 * H:2 * H])
        g_g = jnp.tanh(gates[:, 2 * H:3 * H])
        o_g = jax.nn.sigmoid(gates[:, 3 * H:4 * H])
        c = f_g * c + i_g * g_g
        h = o_g * jnp.tanh(c)
        hs.append(h)
    hs = jnp.stack(hs, 0)                                        # (S, B, H)
    return jax.nn.sigmoid(hs @ params["w_out"] + params["b_out"])


if __name__ == "__main__":
    # Small shapes implied by the module:
    #   batch=2, seq=8, window_length=8 -> input feature dim = 40,
    #   act_emb (E)=32, hidden_dim (H)=32
    B, S, WIN, E, H = 2, 8, 8, 32, 32
    D = WIN * 5

    key = jax.random.PRNGKey(0)
    ks = jax.random.split(key, 10)

    params = {
        # act_embedding: Linear(D -> E), stored transposed for x @ W
        "w_emb": jax.random.uniform(ks[0], (D, E), jnp.float32, -0.1, 0.1),
        "b_emb": jax.random.uniform(ks[1], (1, E), jnp.float32, -0.1, 0.1),
        # LSTM(E -> H): torch weight_ih (4H, E) / weight_hh (4H, H), transposed
        "w_ih": jax.random.uniform(ks[2], (E, 4 * H), jnp.float32, -0.1, 0.1),
        "w_hh": jax.random.uniform(ks[3], (H, 4 * H), jnp.float32, -0.1, 0.1),
        # b_ih + b_hh folded into one (1, 4H) bias
        "b_lstm": jax.random.uniform(ks[4], (1, 4 * H), jnp.float32, -0.1, 0.1),
        # hidden2label: Linear(H -> 1), stored transposed
        "w_out": jax.random.uniform(ks[5], (H, 1), jnp.float32, -0.1, 0.1),
        "b_out": jax.random.uniform(ks[6], (1, 1), jnp.float32, -0.1, 0.1),
    }

    # init_hidden with initialize='rand' -> uniform [0, 1) states
    h0 = jax.random.uniform(ks[7], (B, H), jnp.float32)
    c0 = jax.random.uniform(ks[8], (B, H), jnp.float32)

    prev_window = jax.random.normal(ks[9], (B, S, D), jnp.float32)

    forward = make_forward(params)
    y = jax.block_until_ready(forward(prev_window, h0, c0))

    y_ref = jax.block_until_ready(_reference_forward(prev_window, params, h0, c0))
    # Tolerance loosened vs. the all-f32 version because MXU operands are bf16
    # (accumulation stays f32); observed error is a few 1e-4.
    np.testing.assert_allclose(np.asarray(y), np.asarray(y_ref),
                               rtol=1e-2, atol=1e-2)
    assert y.shape == (S, B, 1)
    print("KERNEL_OK")
</pallas_src>

<mosaic_0001>
module attributes {stable_mosaic.version = 11 : i64} {
  func.func @_rnn_kernel(%arg0: memref<64x40xf32, #tpu.memory_space<vmem>>, %arg1: memref<248x128xf32, #tpu.memory_space<vmem>>, %arg2: memref<16x32xf32, #tpu.memory_space<vmem>>, %arg3: memref<1xf32, #tpu.memory_space<smem>>, %arg4: memref<64x1xf32, #tpu.memory_space<vmem>>) attributes {dimension_semantics = [], scalar_prefetch = 0 : i64, scratch_operands = 0 : i64, tpu.core_type = #tpu.core_type<tc>} {
    %c0 = arith.constant 0 : index
    %c0_0 = arith.constant 0 : index
    %0 = vector.load %arg1[%c0, %c0_0] : memref<248x128xf32, #tpu.memory_space<vmem>>, vector<40x128xf32>
    %1 = arith.truncf %0 : vector<40x128xf32> to vector<40x128xbf16>
    %c40 = arith.constant 40 : index
    %c0_1 = arith.constant 0 : index
    %2 = vector.load %arg1[%c40, %c0_1] : memref<248x128xf32, #tpu.memory_space<vmem>>, vector<1x128xf32>
    %c48 = arith.constant 48 : index
    %c0_2 = arith.constant 0 : index
    %3 = vector.load %arg1[%c48, %c0_2] : memref<248x128xf32, #tpu.memory_space<vmem>>, vector<128x128xf32>
    %4 = arith.truncf %3 : vector<128x128xf32> to vector<128x128xbf16>
    %c176 = arith.constant 176 : index
    %c0_3 = arith.constant 0 : index
    %5 = vector.load %arg1[%c176, %c0_3] : memref<248x128xf32, #tpu.memory_space<vmem>>, vector<32x128xf32>
    %6 = arith.truncf %5 : vector<32x128xf32> to vector<32x128xbf16>
    %c208 = arith.constant 208 : index
    %c0_4 = arith.constant 0 : index
    %7 = vector.load %arg1[%c208, %c0_4] : memref<248x128xf32, #tpu.memory_space<vmem>>, vector<1x128xf32>
    %c216 = arith.constant 216 : index
    %c0_5 = arith.constant 0 : index
    %8 = vector.load %arg1[%c216, %c0_5] : memref<248x128xf32, #tpu.memory_space<vmem>>, vector<32x128xf32>
    %9 = vector.extract_strided_slice %8 {offsets = [0, 0], sizes = [32, 1], strides = [1, 1]} : vector<32x128xf32> to vector<32x1xf32>
    %c0_6 = arith.constant 0 : index
    %c0_7 = arith.constant 0 : index
    %10 = vector.load %arg0[%c0_6, %c0_7] : memref<64x40xf32, #tpu.memory_space<vmem>>, vector<64x40xf32>
    %11 = arith.truncf %10 : vector<64x40xf32> to vector<64x40xbf16>
    %cst = arith.constant dense<0.000000e+00> : vector<64x128xf32>
    %12 = tpu.matmul %11, %1, %cst {dimension_numbers = #tpu.dot_dimension_numbers<[1], [0], [0], [1], [0, 0, 1, 1], [], []>} : vector<64x40xbf16>, vector<40x128xbf16>, vector<64x128xf32> -> vector<64x128xf32>
    %13 = vector.broadcast %2 : vector<1x128xf32> to vector<64x128xf32>
    %14 = arith.addf %12, %13 : vector<64x128xf32>
    %cst_8 = arith.constant 0.000000e+00 : f32
    %15 = vector.broadcast %cst_8 : f32 to vector<64x128xf32>
    %16 = arith.maximumf %14, %15 : vector<64x128xf32>
    %17 = arith.truncf %16 : vector<64x128xf32> to vector<64x128xbf16>
    %cst_9 = arith.constant dense<0.000000e+00> : vector<64x128xf32>
    %18 = tpu.matmul %17, %4, %cst_9 {dimension_numbers = #tpu.dot_dimension_numbers<[1], [0], [0], [1], [0, 0, 1, 1], [], []>} : vector<64x128xbf16>, vector<128x128xbf16>, vector<64x128xf32> -> vector<64x128xf32>
    %19 = vector.broadcast %7 : vector<1x128xf32> to vector<64x128xf32>
    %20 = arith.addf %18, %19 : vector<64x128xf32>
    %c0_10 = arith.constant 0 : index
    %c0_11 = arith.constant 0 : index
    %21 = vector.load %arg2[%c0_10, %c0_11] : memref<16x32xf32, #tpu.memory_space<vmem>>, vector<8x32xf32>
    %c8 = arith.constant 8 : index
    %c0_12 = arith.constant 0 : index
    %22 = vector.load %arg2[%c8, %c0_12] : memref<16x32xf32, #tpu.memory_space<vmem>>, vector<8x32xf32>
    %23 = vector.extract_strided_slice %20 {offsets = [0, 0], sizes = [8, 128], strides = [1, 1]} : vector<64x128xf32> to vector<8x128xf32>
    %24 = arith.truncf %21 : vector<8x32xf32> to vector<8x32xbf16>
    %cst_13 = arith.constant dense<0.000000e+00> : vector<8x128xf32>
    %25 = tpu.matmul %24, %6, %cst_13 {dimension_numbers = #tpu.dot_dimension_numbers<[1], [0], [0], [1], [0, 0, 1, 1], [], []>} : vector<8x32xbf16>, vector<32x128xbf16>, vector<8x128xf32> -> vector<8x128xf32>
    %26 = arith.addf %23, %25 : vector<8x128xf32>
    %27 = arith.negf %26 : vector<8x128xf32>
    %28 = math.exp %27 : vector<8x128xf32>
    %cst_14 = arith.constant 1.000000e+00 : f32
    %29 = vector.broadcast %cst_14 : f32 to vector<8x128xf32>
    %30 = arith.addf %29, %28 : vector<8x128xf32>
    %31 = arith.divf %29, %30 : vector<8x128xf32>
    %32 = vector.extract_strided_slice %31 {offsets = [0, 0], sizes = [8, 32], strides = [1, 1]} : vector<8x128xf32> to vector<8x32xf32>
    %33 = vector.extract_strided_slice %31 {offsets = [0, 32], sizes = [8, 32], strides = [1, 1]} : vector<8x128xf32> to vector<8x32xf32>
    %34 = vector.extract_strided_slice %31 {offsets = [0, 64], sizes = [8, 32], strides = [1, 1]} : vector<8x128xf32> to vector<8x32xf32>
    %cst_15 = arith.constant 2.000000e+00 : f32
    %35 = vector.broadcast %cst_15 : f32 to vector<8x32xf32>
    %36 = arith.mulf %35, %34 : vector<8x32xf32>
    %cst_16 = arith.constant 1.000000e+00 : f32
    %37 = vector.broadcast %cst_16 : f32 to vector<8x32xf32>
    %38 = arith.subf %36, %37 : vector<8x32xf32>
    %39 = vector.extract_strided_slice %31 {offsets = [0, 96], sizes = [8, 32], strides = [1, 1]} : vector<8x128xf32> to vector<8x32xf32>
    %40 = arith.mulf %33, %22 : vector<8x32xf32>
    %41 = arith.mulf %32, %38 : vector<8x32xf32>
    %42 = arith.addf %40, %41 : vector<8x32xf32>
    %43 = math.tanh %42 : vector<8x32xf32>
    %44 = arith.mulf %39, %43 : vector<8x32xf32>
    %45 = vector.extract_strided_slice %20 {offsets = [8, 0], sizes = [8, 128], strides = [1, 1]} : vector<64x128xf32> to vector<8x128xf32>
    %46 = arith.truncf %44 : vector<8x32xf32> to vector<8x32xbf16>
    %cst_17 = arith.constant dense<0.000000e+00> : vector<8x128xf32>
    %47 = tpu.matmul %46, %6, %cst_17 {dimension_numbers = #tpu.dot_dimension_numbers<[1], [0], [0], [1], [0, 0, 1, 1], [], []>} : vector<8x32xbf16>, vector<32x128xbf16>, vector<8x128xf32> -> vector<8x128xf32>
    %48 = arith.addf %45, %47 : vector<8x128xf32>
    %49 = arith.negf %48 : vector<8x128xf32>
    %50 = math.exp %49 : vector<8x128xf32>
    %cst_18 = arith.constant 1.000000e+00 : f32
    %51 = vector.broadcast %cst_18 : f32 to vector<8x128xf32>
    %52 = arith.addf %51, %50 : vector<8x128xf32>
    %53 = arith.divf %51, %52 : vector<8x128xf32>
    %54 = vector.extract_strided_slice %53 {offsets = [0, 0], sizes = [8, 32], strides = [1, 1]} : vector<8x128xf32> to vector<8x32xf32>
    %55 = vector.extract_strided_slice %53 {offsets = [0, 32], sizes = [8, 32], strides = [1, 1]} : vector<8x128xf32> to vector<8x32xf32>
    %56 = vector.extract_strided_slice %53 {offsets = [0, 64], sizes = [8, 32], strides = [1, 1]} : vector<8x128xf32> to vector<8x32xf32>
    %cst_19 = arith.constant 2.000000e+00 : f32
    %57 = vector.broadcast %cst_19 : f32 to vector<8x32xf32>
    %58 = arith.mulf %57, %56 : vector<8x32xf32>
    %cst_20 = arith.constant 1.000000e+00 : f32
    %59 = vector.broadcast %cst_20 : f32 to vector<8x32xf32>
    %60 = arith.subf %58, %59 : vector<8x32xf32>
    %61 = vector.extract_strided_slice %53 {offsets = [0, 96], sizes = [8, 32], strides = [1, 1]} : vector<8x128xf32> to vector<8x32xf32>
    %62 = arith.mulf %55, %42 : vector<8x32xf32>
    %63 = arith.mulf %54, %60 : vector<8x32xf32>
    %64 = arith.addf %62, %63 : vector<8x32xf32>
    %65 = math.tanh %64 : vector<8x32xf32>
    %66 = arith.mulf %61, %65 : vector<8x32xf32>
    %67 = vector.extract_strided_slice %20 {offsets = [16, 0], sizes = [8, 128], strides = [1, 1]} : vector<64x128xf32> to vector<8x128xf32>
    %68 = arith.truncf %66 : vector<8x32xf32> to vector<8x32xbf16>
    %cst_21 = arith.constant dense<0.000000e+00> : vector<8x128xf32>
    %69 = tpu.matmul %68, %6, %cst_21 {dimension_numbers = #tpu.dot_dimension_numbers<[1], [0], [0], [1], [0, 0, 1, 1], [], []>} : vector<8x32xbf16>, vector<32x128xbf16>, vector<8x128xf32> -> vector<8x128xf32>
    %70 = arith.addf %67, %69 : vector<8x128xf32>
    %71 = arith.negf %70 : vector<8x128xf32>
    %72 = math.exp %71 : vector<8x128xf32>
    %cst_22 = arith.constant 1.000000e+00 : f32
    %73 = vector.broadcast %cst_22 : f32 to vector<8x128xf32>
    %74 = arith.addf %73, %72 : vector<8x128xf32>
    %75 = arith.divf %73, %74 : vector<8x128xf32>
    %76 = vector.extract_strided_slice %75 {offsets = [0, 0], sizes = [8, 32], strides = [1, 1]} : vector<8x128xf32> to vector<8x32xf32>
    %77 = vector.extract_strided_slice %75 {offsets = [0, 32], sizes = [8, 32], strides = [1, 1]} : vector<8x128xf32> to vector<8x32xf32>
    %78 = vector.extract_strided_slice %75 {offsets = [0, 64], sizes = [8, 32], strides = [1, 1]} : vector<8x128xf32> to vector<8x32xf32>
    %cst_23 = arith.constant 2.000000e+00 : f32
    %79 = vector.broadcast %cst_23 : f32 to vector<8x32xf32>
    %80 = arith.mulf %79, %78 : vector<8x32xf32>
    %cst_24 = arith.constant 1.000000e+00 : f32
    %81 = vector.broadcast %cst_24 : f32 to vector<8x32xf32>
    %82 = arith.subf %80, %81 : vector<8x32xf32>
    %83 = vector.extract_strided_slice %75 {offsets = [0, 96], sizes = [8, 32], strides = [1, 1]} : vector<8x128xf32> to vector<8x32xf32>
    %84 = arith.mulf %77, %64 : vector<8x32xf32>
    %85 = arith.mulf %76, %82 : vector<8x32xf32>
    %86 = arith.addf %84, %85 : vector<8x32xf32>
    %87 = math.tanh %86 : vector<8x32xf32>
    %88 = arith.mulf %83, %87 : vector<8x32xf32>
    %89 = vector.extract_strided_slice %20 {offsets = [24, 0], sizes = [8, 128], strides = [1, 1]} : vector<64x128xf32> to vector<8x128xf32>
    %90 = arith.truncf %88 : vector<8x32xf32> to vector<8x32xbf16>
    %cst_25 = arith.constant dense<0.000000e+00> : vector<8x128xf32>
    %91 = tpu.matmul %90, %6, %cst_25 {dimension_numbers = #tpu.dot_dimension_numbers<[1], [0], [0], [1], [0, 0, 1, 1], [], []>} : vector<8x32xbf16>, vector<32x128xbf16>, vector<8x128xf32> -> vector<8x128xf32>
    %92 = arith.addf %89, %91 : vector<8x128xf32>
    %93 = arith.negf %92 : vector<8x128xf32>
    %94 = math.exp %93 : vector<8x128xf32>
    %cst_26 = arith.constant 1.000000e+00 : f32
    %95 = vector.broadcast %cst_26 : f32 to vector<8x128xf32>
    %96 = arith.addf %95, %94 : vector<8x128xf32>
    %97 = arith.divf %95, %96 : vector<8x128xf32>
    %98 = vector.extract_strided_slice %97 {offsets = [0, 0], sizes = [8, 32], strides = [1, 1]} : vector<8x128xf32> to vector<8x32xf32>
    %99 = vector.extract_strided_slice %97 {offsets = [0, 32], sizes = [8, 32], strides = [1, 1]} : vector<8x128xf32> to vector<8x32xf32>
    %100 = vector.extract_strided_slice %97 {offsets = [0, 64], sizes = [8, 32], strides = [1, 1]} : vector<8x128xf32> to vector<8x32xf32>
    %cst_27 = arith.constant 2.000000e+00 : f32
    %101 = vector.broadcast %cst_27 : f32 to vector<8x32xf32>
    %102 = arith.mulf %101, %100 : vector<8x32xf32>
    %cst_28 = arith.constant 1.000000e+00 : f32
    %103 = vector.broadcast %cst_28 : f32 to vector<8x32xf32>
    %104 = arith.subf %102, %103 : vector<8x32xf32>
    %105 = vector.extract_strided_slice %97 {offsets = [0, 96], sizes = [8, 32], strides = [1, 1]} : vector<8x128xf32> to vector<8x32xf32>
    %106 = arith.mulf %99, %86 : vector<8x32xf32>
    %107 = arith.mulf %98, %104 : vector<8x32xf32>
    %108 = arith.addf %106, %107 : vector<8x32xf32>
    %109 = math.tanh %108 : vector<8x32xf32>
    %110 = arith.mulf %105, %109 : vector<8x32xf32>
    %111 = vector.extract_strided_slice %20 {offsets = [32, 0], sizes = [8, 128], strides = [1, 1]} : vector<64x128xf32> to vector<8x128xf32>
    %112 = arith.truncf %110 : vector<8x32xf32> to vector<8x32xbf16>
    %cst_29 = arith.constant dense<0.000000e+00> : vector<8x128xf32>
    %113 = tpu.matmul %112, %6, %cst_29 {dimension_numbers = #tpu.dot_dimension_numbers<[1], [0], [0], [1], [0, 0, 1, 1], [], []>} : vector<8x32xbf16>, vector<32x128xbf16>, vector<8x128xf32> -> vector<8x128xf32>
    %114 = arith.addf %111, %113 : vector<8x128xf32>
    %115 = arith.negf %114 : vector<8x128xf32>
    %116 = math.exp %115 : vector<8x128xf32>
    %cst_30 = arith.constant 1.000000e+00 : f32
    %117 = vector.broadcast %cst_30 : f32 to vector<8x128xf32>
    %118 = arith.addf %117, %116 : vector<8x128xf32>
    %119 = arith.divf %117, %118 : vector<8x128xf32>
    %120 = vector.extract_strided_slice %119 {offsets = [0, 0], sizes = [8, 32], strides = [1, 1]} : vector<8x128xf32> to vector<8x32xf32>
    %121 = vector.extract_strided_slice %119 {offsets = [0, 32], sizes = [8, 32], strides = [1, 1]} : vector<8x128xf32> to vector<8x32xf32>
    %122 = vector.extract_strided_slice %119 {offsets = [0, 64], sizes = [8, 32], strides = [1, 1]} : vector<8x128xf32> to vector<8x32xf32>
    %cst_31 = arith.constant 2.000000e+00 : f32
    %123 = vector.broadcast %cst_31 : f32 to vector<8x32xf32>
    %124 = arith.mulf %123, %122 : vector<8x32xf32>
    %cst_32 = arith.constant 1.000000e+00 : f32
    %125 = vector.broadcast %cst_32 : f32 to vector<8x32xf32>
    %126 = arith.subf %124, %125 : vector<8x32xf32>
    %127 = vector.extract_strided_slice %119 {offsets = [0, 96], sizes = [8, 32], strides = [1, 1]} : vector<8x128xf32> to vector<8x32xf32>
    %128 = arith.mulf %121, %108 : vector<8x32xf32>
    %129 = arith.mulf %120, %126 : vector<8x32xf32>
    %130 = arith.addf %128, %129 : vector<8x32xf32>
    %131 = math.tanh %130 : vector<8x32xf32>
    %132 = arith.mulf %127, %131 : vector<8x32xf32>
    %133 = vector.extract_strided_slice %20 {offsets = [40, 0], sizes = [8, 128], strides = [1, 1]} : vector<64x128xf32> to vector<8x128xf32>
    %134 = arith.truncf %132 : vector<8x32xf32> to vector<8x32xbf16>
    %cst_33 = arith.constant dense<0.000000e+00> : vector<8x128xf32>
    %135 = tpu.matmul %134, %6, %cst_33 {dimension_numbers = #tpu.dot_dimension_numbers<[1], [0], [0], [1], [0, 0, 1, 1], [], []>} : vector<8x32xbf16>, vector<32x128xbf16>, vector<8x128xf32> -> vector<8x128xf32>
    %136 = arith.addf %133, %135 : vector<8x128xf32>
    %137 = arith.negf %136 : vector<8x128xf32>
    %138 = math.exp %137 : vector<8x128xf32>
    %cst_34 = arith.constant 1.000000e+00 : f32
    %139 = vector.broadcast %cst_34 : f32 to vector<8x128xf32>
    %140 = arith.addf %139, %138 : vector<8x128xf32>
    %141 = arith.divf %139, %140 : vector<8x128xf32>
    %142 = vector.extract_strided_slice %141 {offsets = [0, 0], sizes = [8, 32], strides = [1, 1]} : vector<8x128xf32> to vector<8x32xf32>
    %143 = vector.extract_strided_slice %141 {offsets = [0, 32], sizes = [8, 32], strides = [1, 1]} : vector<8x128xf32> to vector<8x32xf32>
    %144 = vector.extract_strided_slice %141 {offsets = [0, 64], sizes = [8, 32], strides = [1, 1]} : vector<8x128xf32> to vector<8x32xf32>
    %cst_35 = arith.constant 2.000000e+00 : f32
    %145 = vector.broadcast %cst_35 : f32 to vector<8x32xf32>
    %146 = arith.mulf %145, %144 : vector<8x32xf32>
    %cst_36 = arith.constant 1.000000e+00 : f32
    %147 = vector.broadcast %cst_36 : f32 to vector<8x32xf32>
    %148 = arith.subf %146, %147 : vector<8x32xf32>
    %149 = vector.extract_strided_slice %141 {offsets = [0, 96], sizes = [8, 32], strides = [1, 1]} : vector<8x128xf32> to vector<8x32xf32>
    %150 = arith.mulf %143, %130 : vector<8x32xf32>
    %151 = arith.mulf %142, %148 : vector<8x32xf32>
    %152 = arith.addf %150, %151 : vector<8x32xf32>
    %153 = math.tanh %152 : vector<8x32xf32>
    %154 = arith.mulf %149, %153 : vector<8x32xf32>
    %155 = vector.extract_strided_slice %20 {offsets = [48, 0], sizes = [8, 128], strides = [1, 1]} : vector<64x128xf32> to vector<8x128xf32>
    %156 = arith.truncf %154 : vector<8x32xf32> to vector<8x32xbf16>
    %cst_37 = arith.constant dense<0.000000e+00> : vector<8x128xf32>
    %157 = tpu.matmul %156, %6, %cst_37 {dimension_numbers = #tpu.dot_dimension_numbers<[1], [0], [0], [1], [0, 0, 1, 1], [], []>} : vector<8x32xbf16>, vector<32x128xbf16>, vector<8x128xf32> -> vector<8x128xf32>
    %158 = arith.addf %155, %157 : vector<8x128xf32>
    %159 = arith.negf %158 : vector<8x128xf32>
    %160 = math.exp %159 : vector<8x128xf32>
    %cst_38 = arith.constant 1.000000e+00 : f32
    %161 = vector.broadcast %cst_38 : f32 to vector<8x128xf32>
    %162 = arith.addf %161, %160 : vector<8x128xf32>
    %163 = arith.divf %161, %162 : vector<8x128xf32>
    %164 = vector.extract_strided_slice %163 {offsets = [0, 0], sizes = [8, 32], strides = [1, 1]} : vector<8x128xf32> to vector<8x32xf32>
    %165 = vector.extract_strided_slice %163 {offsets = [0, 32], sizes = [8, 32], strides = [1, 1]} : vector<8x128xf32> to vector<8x32xf32>
    %166 = vector.extract_strided_slice %163 {offsets = [0, 64], sizes = [8, 32], strides = [1, 1]} : vector<8x128xf32> to vector<8x32xf32>
    %cst_39 = arith.constant 2.000000e+00 : f32
    %167 = vector.broadcast %cst_39 : f32 to vector<8x32xf32>
    %168 = arith.mulf %167, %166 : vector<8x32xf32>
    %cst_40 = arith.constant 1.000000e+00 : f32
    %169 = vector.broadcast %cst_40 : f32 to vector<8x32xf32>
    %170 = arith.subf %168, %169 : vector<8x32xf32>
    %171 = vector.extract_strided_slice %163 {offsets = [0, 96], sizes = [8, 32], strides = [1, 1]} : vector<8x128xf32> to vector<8x32xf32>
    %172 = arith.mulf %165, %152 : vector<8x32xf32>
    %173 = arith.mulf %164, %170 : vector<8x32xf32>
    %174 = arith.addf %172, %173 : vector<8x32xf32>
    %175 = math.tanh %174 : vector<8x32xf32>
    %176 = arith.mulf %171, %175 : vector<8x32xf32>
    %177 = vector.extract_strided_slice %20 {offsets = [56, 0], sizes = [8, 128], strides = [1, 1]} : vector<64x128xf32> to vector<8x128xf32>
    %178 = arith.truncf %176 : vector<8x32xf32> to vector<8x32xbf16>
    %cst_41 = arith.constant dense<0.000000e+00> : vector<8x128xf32>
    %179 = tpu.matmul %178, %6, %cst_41 {dimension_numbers = #tpu.dot_dimension_numbers<[1], [0], [0], [1], [0, 0, 1, 1], [], []>} : vector<8x32xbf16>, vector<32x128xbf16>, vector<8x128xf32> -> vector<8x128xf32>
    %180 = arith.addf %177, %179 : vector<8x128xf32>
    %181 = arith.negf %180 : vector<8x128xf32>
    %182 = math.exp %181 : vector<8x128xf32>
    %cst_42 = arith.constant 1.000000e+00 : f32
    %183 = vector.broadcast %cst_42 : f32 to vector<8x128xf32>
    %184 = arith.addf %183, %182 : vector<8x128xf32>
    %185 = arith.divf %183, %184 : vector<8x128xf32>
    %186 = vector.extract_strided_slice %185 {offsets = [0, 0], sizes = [8, 32], strides = [1, 1]} : vector<8x128xf32> to vector<8x32xf32>
    %187 = vector.extract_strided_slice %185 {offsets = [0, 32], sizes = [8, 32], strides = [1, 1]} : vector<8x128xf32> to vector<8x32xf32>
    %188 = vector.extract_strided_slice %185 {offsets = [0, 64], sizes = [8, 32], strides = [1, 1]} : vector<8x128xf32> to vector<8x32xf32>
    %cst_43 = arith.constant 2.000000e+00 : f32
    %189 = vector.broadcast %cst_43 : f32 to vector<8x32xf32>
    %190 = arith.mulf %189, %188 : vector<8x32xf32>
    %cst_44 = arith.constant 1.000000e+00 : f32
    %191 = vector.broadcast %cst_44 : f32 to vector<8x32xf32>
    %192 = arith.subf %190, %191 : vector<8x32xf32>
    %193 = vector.extract_strided_slice %185 {offsets = [0, 96], sizes = [8, 32], strides = [1, 1]} : vector<8x128xf32> to vector<8x32xf32>
    %194 = arith.mulf %187, %174 : vector<8x32xf32>
    %195 = arith.mulf %186, %192 : vector<8x32xf32>
    %196 = arith.addf %194, %195 : vector<8x32xf32>
    %197 = math.tanh %196 : vector<8x32xf32>
    %198 = arith.mulf %193, %197 : vector<8x32xf32>
    %199 = tpu.concatenate %44, %66, %88, %110, %132, %154, %176, %198 in 0 : vector<8x32xf32>, vector<8x32xf32>, vector<8x32xf32>, vector<8x32xf32>, vector<8x32xf32>, vector<8x32xf32>, vector<8x32xf32>, vector<8x32xf32> -> vector<64x32xf32>
    %cst_45 = arith.constant dense<0.000000e+00> : vector<64x1xf32>
    %200 = tpu.matmul %199, %9, %cst_45 {dimension_numbers = #tpu.dot_dimension_numbers<[1], [0], [0], [1], [0, 0, 1, 1], [], []>} : vector<64x32xf32>, vector<32x1xf32>, vector<64x1xf32> -> vector<64x1xf32>
    %c0_46 = arith.constant 0 : index
    %201 = memref.load %arg3[%c0_46] : memref<1xf32, #tpu.memory_space<smem>>
    %202 = vector.broadcast %201 : f32 to vector<64x1xf32>
    %203 = arith.addf %200, %202 : vector<64x1xf32>
    %204 = arith.negf %203 : vector<64x1xf32>
    %205 = math.exp %204 : vector<64x1xf32>
    %cst_47 = arith.constant 1.000000e+00 : f32
    %206 = vector.broadcast %cst_47 : f32 to vector<64x1xf32>
    %207 = arith.addf %206, %205 : vector<64x1xf32>
    %208 = arith.divf %206, %207 : vector<64x1xf32>
    %c0_48 = arith.constant 0 : index
    %c0_49 = arith.constant 0 : index
    %209 = vector.load %arg4[%c0_48, %c0_49] : memref<64x1xf32, #tpu.memory_space<vmem>>, vector<64x1xf32>
    tpu.vector_store %arg4[%c0_48, %c0_49], %208 {strides = array<i32>} : memref<64x1xf32, #tpu.memory_space<vmem>>, vector<64x1xf32>,
    return
  }
}

</mosaic_0001>

<bundles_post_ra>
// kernel: forward.1
= control target key start
LH: loop header
LB: loop body
LE: loop exit
PB: predicated region body
PF: predicated region fallthrough
CT: control target
= control target key end

     0   :  { %10 = vsyncpa [#allocation4], 0  ;;  %s1386_s15 = smov [#allocation3]   ;;  %s1646_s0 = inlined_call_operand.vmem [shape: f32[64,40], index: 0, kind: input, shape index: {}]   ;;  %s1647_s1 = inlined_call_operand.hbm [shape: f32[248,128], index: 1, kind: input, shape index: {}]   ;;  %s1648_s2 = inlined_call_operand.vmem [shape: f32[16,32], index: 2, kind: input, shape index: {}]   ;;  %s1649_s3 = inlined_call_operand.<no memory space> [shape: f32[1], index: 3, kind: input, shape index: {}]   ;;  %s1650_s4 = inlined_call_operand.vmem [shape: f32[64,1], index: 4, kind: output, shape index: {}]  }
   0x1   :  { %s18_s16 = sshll.u32 %s1386_s15, 4  ;;  %s19_s16 = int_to_ptr.vmem [resolvable:$true] %s18_s16 }
   0x2   :  { %s1372_s17 = scalar_lea.vmem %s19_s16, 3968  ;;  %p1377_p1 = scmp.lt.s32.totalorder %s19_s16, %s19_s16 }
   0x3   :  { %p1373_p0 = scmp.ne.s32.totalorder %s19_s16, %s1372_s17  ;;  %p1378_p2 = scmp.lt.s32.totalorder %s1372_s17, %s1372_s17 }
   0x5   :  { %p1379_p3 = por %p1378_p2, %p1377_p1 }
   0x7   :  { %p1380_p4 = pnand %p1379_p3, %p1373_p0 }
   0x9   :  { %1383 = shalt.err (!%p1380_p4)
}
   0xa   :  { %s1387_s18 = smov 128   ;;  %s1388_s19 = smov 8  }
   0xb   :  { %24 = dma.hbm_to_vmem [thread:$0]  %s1647_s1, 3968, %s19_s16, [#allocation4], %s1387_s18, %s1387_s18, %s1388_s19  }
   0xc   :  { %1384 = dma.done.wait [#allocation4], 3968  }
   0xd   :  { %1385 = vsyncadd [#allocation4], 4294963328  ;;  %v37_v0 = vld [vmem:[#allocation3 + $0x20] sm:$0xff]  ;;  %vm106_vm0 = vcmask 1043456   ;;  %v35_v1 = vld [vmem:[#allocation3 + $0x10] sm:$0xff]  ;;  %vm93_vm1 = vcmask 326656  }
   0xe   :  { %v36_v2 = vld [vmem:[#allocation3 + $0x18] sm:$0xff]  ;;  %v40_v3 = vpack.c.bf16 %v37_v0, %v37_v0  ;;  %v77_v5 = vld [vmem:[%s1646_s0] sm:$0xff]  ;;  %v34_v7 = vld [vmem:[#allocation3 + $0x8] sm:$0xff]  ;;  %v1389_v45 = vmov 0.0   ;;  %vm1390_vm2 = vmmov 0   ;;  %vm259_vm3 = vcmask 261120  }
   0xf   :  { %v39_v4 = vpack.c.bf16 %v36_v2, %v35_v1  ;;  %v33_v6 = vld [vmem:[#allocation3] sm:$0xff]  ;;  %v78_v8 = vld [vmem:[%s1646_s0 + $0x8] sm:$0xff]  ;;  %v54_v15 = vld [vmem:[#allocation3 + $0x90] sm:$0xff]  ;;  %s1391_s12 = smov 64   ;;  %s1392_s15 = smov 32   ;;  %vm1039_vm4 = vcmask 7168  }
  0x10   :  { %1276 = vmatprep.subr.msk.bf16.mxu0 %vm106_vm0, %v40_v3  ;;  %v108_v9 = vsel %vm106_vm0, %v40_v3, 0  ;;  %v85_v10 = vpack.c.bf16 %v78_v8, %v77_v5  ;;  %v56_v11 = vld [vmem:[#allocation3 + $0xa0] sm:$0xff]  ;;  %v57_v12 = vld [vmem:[#allocation3 + $0xa8] sm:$0xff]  ;;  %v38_v13 = vpack.c.bf16 %v34_v7, %v33_v6  ;;  %v55_v16 = vld [vmem:[#allocation3 + $0x98] sm:$0xff] }
  0x11   :  { %1155 = vmatpush3.bf16.msra.mxu0 %v108_v9  ;;  %v65_v14 = vpack.c.bf16 %v57_v12, %v56_v11  ;;  %v64_v17 = vpack.c.bf16 %v55_v16, %v54_v15  ;;  %v52_v18 = vld [vmem:[#allocation3 + $0x80] sm:$0xff]  ;;  %v53_v19 = vld [vmem:[#allocation3 + $0x88] sm:$0xff]  ;;  %v79_v20 = vld [vmem:[%s1646_s0 + $0x10] sm:$0xff] }
  0x12   :  { %1156 = vmatprep.subr.bf16.mxu0 %v39_v4  ;;  %1160 = vmatprep.mubr.msk.bf16.mxu0 %vm93_vm1, %v85_v10  ;;  %v80_v21 = vld [vmem:[%s1646_s0 + $0x18] sm:$0xff]  ;;  %v81_v22 = vld [vmem:[%s1646_s0 + $0x20] sm:$0xff]  ;;  %v82_v23 = vld [vmem:[%s1646_s0 + $0x28] sm:$0xff]  ;;  %v63_v24 = vpack.c.bf16 %v53_v19, %v52_v18 }
  0x13   :  { %1168 = vmatprep.subr.bf16.mxu1 %v65_v14  ;;  %v50_v25 = vld [vmem:[#allocation3 + $0x70] sm:$0xff]  ;;  %v51_v26 = vld [vmem:[#allocation3 + $0x78] sm:$0xff]  ;;  %v86_v27 = vpack.c.bf16 %v80_v21, %v79_v20  ;;  %v87_v28 = vpack.c.bf16 %v82_v23, %v81_v22  ;;  %v48_v30 = vld [vmem:[#allocation3 + $0x60] sm:$0xff] }
  0x14   :  { %1169 = vmatpush3.bf16.msra.mxu1 %v65_v14  ;;  %v62_v29 = vpack.c.bf16 %v51_v26, %v50_v25  ;;  %v49_v31 = vld [vmem:[#allocation3 + $0x68] sm:$0xff]  ;;  %v83_v32 = vld [vmem:[%s1646_s0 + $0x30] sm:$0xff]  ;;  %v84_v33 = vld [vmem:[%s1646_s0 + $0x38] sm:$0xff] }
  0x15   :  { %1157 = vmatpush3.bf16.msra.mxu0 %v39_v4  ;;  %1170 = vmatprep.subr.bf16.mxu1 %v64_v17  ;;  %v61_v34 = vpack.c.bf16 %v49_v31, %v48_v30  ;;  %v88_v35 = vpack.c.bf16 %v84_v33, %v83_v32  ;;  %v46_v36 = vld [vmem:[#allocation3 + $0x50] sm:$0xff]  ;;  %v47_v37 = vld [vmem:[#allocation3 + $0x58] sm:$0xff]  ;;  %v44_v39 = vld [vmem:[#allocation3 + $0x40] sm:$0xff] }
  0x16   :  { %1158 = vmatprep.subr.bf16.mxu0 %v38_v13  ;;  %v60_v38 = vpack.c.bf16 %v47_v37, %v46_v36  ;;  %v45_v40 = vld [vmem:[#allocation3 + $0x48] sm:$0xff]  ;;  %v42_v42 = vld [vmem:[#allocation3 + $0x30] sm:$0xff]  ;;  %v43_v43 = vld [vmem:[#allocation3 + $0x38] sm:$0xff] }
  0x17   :  { %v59_v41 = vpack.c.bf16 %v45_v40, %v44_v39  ;;  %v58_v44 = vpack.c.bf16 %v43_v43, %v42_v42  ;;  %v68_v46 = vld [vmem:[#allocation3 + $0xc0] sm:$0xff]  ;;  %v69_v47 = vld [vmem:[#allocation3 + $0xc8] sm:$0xff]  ;;  %v66_v49 = vld [vmem:[#allocation3 + $0xb0] sm:$0xff] }
  0x18   :  { %1171 = vmatpush3.bf16.msra.mxu1 %v64_v17  ;;  %v1451_v48 = vpack.c.bf16 %v69_v47, %v68_v46  ;;  %v67_v50 = vld [vmem:[#allocation3 + $0xb8] sm:$0xff]  ;;  %v1053_v54 = vld [vmem:[#allocation3 + $0x28] ss:$0 sm:$0xff]  ;;  %v256_v17 = vld [vmem:[%s1648_s2] sm:$0xff] }
  0x19   :  { %1159 = vmatpush3.bf16.msra.mxu0 %v38_v13  ;;  %1172 = vmatprep.subr.bf16.mxu1 %v63_v24  ;;  %v1457_v51 = vpack.c.bf16 %v67_v50, %v66_v49  ;;  %v258_v18 = vpack.c.bf16 %v256_v17, %v256_v17  ;;  %v1058_v19 = vld [vmem:[#allocation3 + $0xd0] ss:$0 sm:$0xff]  ;;  %v257_v49 = vld [vmem:[%s1648_s2 + $0x8] sm:$0xff] }
  0x1a   :  { %1200 = vmatprep.subr.bf16.mxu0 %v1389_v45 }
  0x1c   :  { %1161 = vmatmul.mubr.msk.bf16.vlgmr.msra.gmra.mxu0 %vm93_vm1, %v86_v27  ;;  %1173 = vmatpush3.bf16.msra.mxu1 %v63_v24 }
  0x1d   :  { %1164 = vmatprep.mubr.msk.bf16.mxu0 %vm93_vm1, %v87_v28  ;;  %1174 = vmatprep.subr.bf16.mxu1 %v62_v29 }
  0x1e   :  { %1201 = vmatpush3.bf16.msra.mxu0 %v1451_v48 }
  0x1f   :  { %1202 = vmatprep.subr.bf16.mxu0 %v1389_v45 }
  0x20   :  { %1175 = vmatpush3.bf16.msra.mxu1 %v62_v29 }
  0x21   :  { %1176 = vmatprep.subr.bf16.mxu1 %v61_v34 }
  0x22   :  { %1203 = vmatpush3.bf16.msra.mxu0 %v1457_v51 }
  0x23   :  { %1208 = vmatprep.subr.bf16.mxu0 %v1389_v45 }
  0x24   :  { %1165 = vmatmul.mubr.msk.bf16.gmra.mxu0 %vm93_vm1, %v88_v35  ;;  %1177 = vmatpush3.bf16.msra.mxu1 %v61_v34 }
  0x25   :  { %1178 = vmatprep.subr.bf16.mxu1 %v60_v38  ;;  %1204 = vmatprep.mubr.msk.bf16.mxu0 %vm1390_vm2, %v1389_v45 }
  0x28   :  { %1179 = vmatpush3.bf16.msra.mxu1 %v60_v38 }
  0x29   :  { %1180 = vmatprep.subr.bf16.mxu1 %v59_v41 }
  0x2c   :  { %1181 = vmatpush3.bf16.msra.mxu1 %v59_v41 }
  0x2d   :  { %1182 = vmatprep.subr.bf16.mxu1 %v58_v44 }
  0x30   :  { %1183 = vmatpush3.bf16.msra.mxu1 %v58_v44 }
  0x31   :  { %1192 = vmatprep.subr.bf16.mxu1 %v1389_v45 }
  0xdc   :  { %v1162_v52 = vpop.f32.mrf.mxu0 }
  0xdd   :  { %v153_v58 = vadd.f32 %v1162_v52, %v1053_v54 }
  0xde   :  { %v144_v53 = vpop.f32.mrf.mxu0 }
  0xdf   :  { %v145_v56 = vadd.f32 %v1053_v54, %v144_v53  ;;  %v177_v1 = vmax.f32 %v153_v58, 0.0 }
  0xe0   :  { %v1163_v55 = vpop.f32.mrf.mxu0 }
  0xe1   :  { %v156_v57 = vadd.f32 %v1163_v55, %v1053_v54  ;;  %v175_v63 = vmax.f32 %v145_v56, 0.0 }
  0xe2   :  { %v147_v59 = vpop.f32.mrf.mxu0 }
  0xe3   :  { %v148_v60 = vadd.f32 %v1053_v54, %v147_v59  ;;  %v178_v61 = vmax.f32 %v156_v57, 0.0 }
  0xe4   :  { %v1166_v62 = vpop.f32.mrf.mxu0 }
  0xe5   :  { %v176_v0 = vmax.f32 %v148_v60, 0.0  ;;  %v184_v4 = vpack.c.bf16 %v178_v61, %v177_v1  ;;  %v169_v8 = vadd.f32 %v1166_v62, %v1053_v54 }
  0xe6   :  { %v160_v2 = vpop.f32.mrf.mxu0 }
  0xe7   :  { %v183_v3 = vpack.c.bf16 %v176_v0, %v175_v63  ;;  %v161_v6 = vadd.f32 %v1053_v54, %v160_v2  ;;  %v181_v14 = vmax.f32 %v169_v8, 0.0 }
  0xe8   :  { %v1167_v5 = vpop.f32.mrf.mxu0 }
  0xe9   :  { %v172_v7 = vadd.f32 %v1167_v5, %v1053_v54  ;;  %1184 = vmatprep.mubr.bf16.mxu1 %v183_v3  ;;  %v179_v12 = vmax.f32 %v161_v6, 0.0 }
  0xea   :  { %v163_v9 = vpop.f32.mrf.mxu0  ;;  %1185 = vmatmul.mubr.bf16.vlgmr.msra.gmra.mxu1 %v184_v4 }
  0xeb   :  { %v164_v10 = vadd.f32 %v1053_v54, %v163_v9  ;;  %1193 = vmatpush3.bf16.msra.mxu1 %v1451_v48  ;;  %v182_v11 = vmax.f32 %v172_v7, 0.0 }
  0xec   :  { %1194 = vmatprep.subr.bf16.mxu1 %v1389_v45 }
  0xed   :  { %v180_v13 = vmax.f32 %v164_v10, 0.0  ;;  %v186_v16 = vpack.c.bf16 %v182_v11, %v181_v14 }
  0xef   :  { %v185_v15 = vpack.c.bf16 %v180_v13, %v179_v12  ;;  %1195 = vmatpush3.bf16.msra.mxu1 %v1457_v51 }
  0xf0   :  { %1216 = vmatprep.subr.bf16.mxu1 %v1389_v45 }
  0xf1   :  { %1188 = vmatprep.mubr.bf16.mxu1 %v185_v15 }
  0xf2   :  { %1189 = vmatmul.mubr.bf16.gmra.mxu1 %v186_v16 }
  0xf3   :  { %1196 = vmatprep.mubr.msk.bf16.mxu1 %vm1390_vm2, %v1389_v45 }
  0xfa   :  { %1197 = vmatmul.mubr.msk.bf16.vlgmr.msra.gmra.mxu1 %vm259_vm3, %v258_v18 }
  0xfb   :  { %1217 = vmatpush3.bf16.msra.mxu1 %v1451_v48  ;;  %1220 = vmatprep.mubr.msk.bf16.mxu1 %vm1390_vm2, %v1389_v45 }
  0xfc   :  { %1218 = vmatprep.subr.bf16.mxu1 %v1389_v45 }
  0xff   :  { %1219 = vmatpush3.bf16.msra.mxu1 %v1457_v51 }
 0x100   :  { %1232 = vmatprep.subr.bf16.mxu1 %v1389_v45 }
 0x1aa   :  { %v1186_v20 = vpop.f32.mrf.mxu1 }
 0x1ab   :  { %v1477_v21 = vadd.f32 %v1186_v20, %v1058_v19 }
 0x1ac   :  { %v225_v22 = vpop.f32.mrf.mxu1 }
 0x1ad   :  { %v226_v34 = vadd.f32 %v1058_v19, %v225_v22 }
 0x1ae   :  { %v1187_v23 = vpop.f32.mrf.mxu1 }
 0x1af   :  { %v1479_v24 = vadd.f32 %v1187_v23, %v1058_v19 }
 0x1b0   :  { %v228_v25 = vpop.f32.mrf.mxu1 }
 0x1b1   :  { %v229_v26 = vadd.f32 %v1058_v19, %v228_v25 }
 0x1b2   :  { %v1190_v27 = vpop.f32.mrf.mxu1 }
 0x1b3   :  { %v1481_v28 = vadd.f32 %v1190_v27, %v1058_v19 }
 0x1b4   :  { %v241_v29 = vpop.f32.mrf.mxu1 }
 0x1b5   :  { %v1483_v30 = vadd.f32 %v1058_v19, %v241_v29 }
 0x1b6   :  { %v1191_v31 = vpop.f32.mrf.mxu1 }
 0x1b7   :  { %v1485_v32 = vadd.f32 %v1191_v31, %v1058_v19 }
 0x1b8   :  { %v244_v33 = vpop.f32.mrf.mxu1 }
 0x1b9   :  { %v1487_v35 = vadd.f32 %v1058_v19, %v244_v33 }
 0x1ba   :  { %v297_v36 = vpop.f32.mrf.mxu1 }
 0x1bb   :  { %v303_v37 = vadd.f32 %v297_v36, %v226_v34 }
 0x1bc   :  { %v1198_v38 = vpop.f32.mrf.mxu1 }
 0x1bd   :  { %v1060_v39 = vmul.f32 -1.442695, %v303_v37 }
 0x1be   :  { %v300_v40 = vpop.f32.mrf.mxu1 }
 0x1bf   :  { %1284 = vpow2.f32 %v1060_v39 }
 0x1c0   :  { %v1199_v41 = vpop.f32.mrf.mxu1 }
 0x1cc   :  { %v1285_v42 = vpop.eup %1284 }
 0x1cd   :  { %v307_v43 = vadd.f32 1.0, %v1285_v42 }
 0x1cf   :  { %1286 = vrcp.f32 %v307_v43 }
 0x1dc   :  { %v1287_v44 = vpop.eup %1286 }
 0x1dd   :  { %v310_v46 = vmul.f32 2.0, %v1287_v44 }
 0x1df   :  { %v1061_v47 = vadd.f32 -1.0, %v310_v46 }
 0x1e1   :  { %318 = vrot.lane.b32.xlu0 %v1061_v47, %s1391_s12 }
 0x1e5   :  { %313 = vrot.lane.b32.xlu0 %v257_v49, %s1392_s15 }
 0x253   :  { %v319_v50 = vpop.permute.xlu0 %318 }
 0x254   :  { %v321_v52 = vmul.f32 %v1287_v44, %v319_v50 }
 0x256   :  { %323 = vrot.lane.b32.xlu1 %v321_v52, %s1392_s15 }
 0x257   :  { %v314_v53 = vpop.permute.xlu0 %313 }
 0x258   :  { %v316_v54 = vmul.f32 %v1287_v44, %v314_v53 }
 0x2c8   :  { %v324_v55 = vpop.permute.xlu1 %323 }
 0x2c9   :  { %v326_v56 = vadd.f32 %v324_v55, %v316_v54 }
 0x2cb   :  { %1288 = vtanh.f32 %v326_v56 }
 0x2d8   :  { %v1289_v57 = vpop.eup %1288 }
 0x2d9   :  { %329 = vrot.lane.b32.xlu1 %v1289_v57, %s1391_s12 }
 0x34b   :  { %v330_v58 = vpop.permute.xlu1 %329 }
 0x34c   :  { %v1496_v59 = vmul.f32 %v1287_v44, %v330_v58 }
 0x34e   :  { %v333_v60 = vpack.c.bf16 %v1496_v59, %v1496_v59 }
 0x350   :  { %335 = vrot.lane.b32.xlu0 %v333_v60, %s1392_s15 }
 0x3c2   :  { %v336_v61 = vpop.permute.xlu0 %335 }
 0x3c3   :  { %1205 = vmatmul.mubr.msk.bf16.vlgmr.msra.gmra.mxu0 %vm259_vm3, %v336_v61 }
 0x3c4   :  { %1209 = vmatpush3.bf16.msra.mxu0 %v1451_v48  ;;  %1212 = vmatprep.mubr.msk.bf16.mxu0 %vm1390_vm2, %v1389_v45 }
 0x3c5   :  { %1210 = vmatprep.subr.bf16.mxu0 %v1389_v45 }
 0x3c8   :  { %1211 = vmatpush3.bf16.msra.mxu0 %v1457_v51 }
 0x3c9   :  { %1224 = vmatprep.subr.bf16.mxu0 %v1389_v45 }
 0x483   :  { %v374_v62 = vpop.f32.mrf.mxu0 }
 0x484   :  { %v380_v63 = vadd.f32 %v374_v62, %v229_v26 }
 0x485   :  { %v1206_v0 = vpop.f32.mrf.mxu0 }
 0x486   :  { %v1063_v1 = vmul.f32 -1.442695, %v380_v63 }
 0x487   :  { %v377_v2 = vpop.f32.mrf.mxu0 }
 0x488   :  { %1290 = vpow2.f32 %v1063_v1 }
 0x489   :  { %v1207_v3 = vpop.f32.mrf.mxu0 }
 0x495   :  { %v1291_v4 = vpop.eup %1290 }
 0x496   :  { %v384_v5 = vadd.f32 1.0, %v1291_v4 }
 0x498   :  { %1292 = vrcp.f32 %v384_v5 }
 0x4a5   :  { %v1293_v6 = vpop.eup %1292 }
 0x4a6   :  { %v387_v7 = vmul.f32 2.0, %v1293_v6  ;;  %v389_v11 = vmul.f32 %v1293_v6, %v326_v56 }
 0x4a8   :  { %v1064_v8 = vadd.f32 -1.0, %v387_v7 }
 0x4aa   :  { %391 = vrot.lane.b32.xlu1 %v1064_v8, %s1391_s12 }
 0x51c   :  { %v392_v9 = vpop.permute.xlu1 %391 }
 0x51d   :  { %v394_v10 = vmul.f32 %v1293_v6, %v392_v9 }
 0x51f   :  { %396 = vrot.lane.b32.xlu0 %v394_v10, %s1392_s15 }
 0x591   :  { %v397_v12 = vpop.permute.xlu0 %396 }
 0x592   :  { %v399_v13 = vadd.f32 %v397_v12, %v389_v11 }
 0x594   :  { %1294 = vtanh.f32 %v399_v13 }
 0x5a1   :  { %v1295_v14 = vpop.eup %1294 }
 0x5a2   :  { %402 = vrot.lane.b32.xlu1 %v1295_v14, %s1391_s12 }
 0x614   :  { %v403_v15 = vpop.permute.xlu1 %402 }
 0x615   :  { %v1511_v16 = vmul.f32 %v1293_v6, %v403_v15 }
 0x617   :  { %v406_v17 = vpack.c.bf16 %v1511_v16, %v1511_v16 }
 0x619   :  { %408 = vrot.lane.b32.xlu0 %v406_v17, %s1392_s15 }
 0x68b   :  { %v409_v18 = vpop.permute.xlu0 %408 }
 0x68c   :  { %1213 = vmatmul.mubr.msk.bf16.vlgmr.msra.gmra.mxu0 %vm259_vm3, %v409_v18 }
 0x68d   :  { %1225 = vmatpush3.bf16.msra.mxu0 %v1451_v48  ;;  %1228 = vmatprep.mubr.msk.bf16.mxu0 %vm1390_vm2, %v1389_v45 }
 0x68e   :  { %1226 = vmatprep.subr.bf16.mxu0 %v1389_v45 }
 0x691   :  { %1227 = vmatpush3.bf16.msra.mxu0 %v1457_v51 }
 0x692   :  { %1240 = vmatprep.subr.bf16.mxu0 %v1389_v45 }
 0x74c   :  { %v447_v19 = vpop.f32.mrf.mxu0 }
 0x74d   :  { %v453_v20 = vadd.f32 %v447_v19, %v1477_v21 }
 0x74e   :  { %v1214_v22 = vpop.f32.mrf.mxu0 }
 0x74f   :  { %v1066_v23 = vmul.f32 -1.442695, %v453_v20 }
 0x750   :  { %v450_v25 = vpop.f32.mrf.mxu0 }
 0x751   :  { %1296 = vpow2.f32 %v1066_v23 }
 0x752   :  { %v1215_v26 = vpop.f32.mrf.mxu0 }
 0x75e   :  { %v1297_v27 = vpop.eup %1296 }
 0x75f   :  { %v457_v29 = vadd.f32 1.0, %v1297_v27 }
 0x761   :  { %1298 = vrcp.f32 %v457_v29 }
 0x76e   :  { %v1299_v31 = vpop.eup %1298 }
 0x76f   :  { %v460_v33 = vmul.f32 2.0, %v1299_v31  ;;  %v462_v38 = vmul.f32 %v1299_v31, %v399_v13 }
 0x771   :  { %v1067_v34 = vadd.f32 -1.0, %v460_v33 }
 0x773   :  { %464 = vrot.lane.b32.xlu1 %v1067_v34, %s1391_s12 }
 0x7e5   :  { %v465_v36 = vpop.permute.xlu1 %464 }
 0x7e6   :  { %v467_v37 = vmul.f32 %v1299_v31, %v465_v36 }
 0x7e8   :  { %469 = vrot.lane.b32.xlu0 %v467_v37, %s1392_s15 }
 0x85a   :  { %v470_v39 = vpop.permute.xlu0 %469 }
 0x85b   :  { %v472_v21 = vadd.f32 %v470_v39, %v462_v38 }
 0x85d   :  { %1300 = vtanh.f32 %v472_v21 }
 0x86a   :  { %v1301_v40 = vpop.eup %1300 }
 0x86b   :  { %475 = vrot.lane.b32.xlu1 %v1301_v40, %s1391_s12 }
 0x8dd   :  { %v476_v41 = vpop.permute.xlu1 %475 }
 0x8de   :  { %v1527_v42 = vmul.f32 %v1299_v31, %v476_v41 }
 0x8e0   :  { %v479_v43 = vpack.c.bf16 %v1527_v42, %v1527_v42 }
 0x8e2   :  { %481 = vrot.lane.b32.xlu0 %v479_v43, %s1392_s15 }
 0x954   :  { %v482_v44 = vpop.permute.xlu0 %481 }
 0x955   :  { %1221 = vmatmul.mubr.msk.bf16.vlgmr.msra.gmra.mxu1 %vm259_vm3, %v482_v44 }
 0x956   :  { %1233 = vmatpush3.bf16.msra.mxu1 %v1451_v48  ;;  %1236 = vmatprep.mubr.msk.bf16.mxu1 %vm1390_vm2, %v1389_v45 }
 0x957   :  { %1234 = vmatprep.subr.bf16.mxu1 %v1389_v45 }
 0x95a   :  { %1235 = vmatpush3.bf16.msra.mxu1 %v1457_v51 }
 0x95b   :  { %1248 = vmatprep.subr.bf16.mxu1 %v1389_v45 }
 0xa15   :  { %v520_v46 = vpop.f32.mrf.mxu1 }
 0xa16   :  { %v526_v47 = vadd.f32 %v520_v46, %v1479_v24 }
 0xa17   :  { %v1222_v49 = vpop.f32.mrf.mxu1 }
 0xa18   :  { %v1069_v50 = vmul.f32 -1.442695, %v526_v47 }
 0xa19   :  { %v523_v52 = vpop.f32.mrf.mxu1 }
 0xa1a   :  { %1302 = vpow2.f32 %v1069_v50 }
 0xa1b   :  { %v1223_v53 = vpop.f32.mrf.mxu1 }
 0xa27   :  { %v1303_v54 = vpop.eup %1302 }
 0xa28   :  { %v530_v55 = vadd.f32 1.0, %v1303_v54 }
 0xa2a   :  { %1304 = vrcp.f32 %v530_v55 }
 0xa37   :  { %v1305_v56 = vpop.eup %1304 }
 0xa38   :  { %v533_v57 = vmul.f32 2.0, %v1305_v56  ;;  %v535_v62 = vmul.f32 %v1305_v56, %v472_v21 }
 0xa3a   :  { %v1070_v58 = vadd.f32 -1.0, %v533_v57 }
 0xa3c   :  { %537 = vrot.lane.b32.xlu1 %v1070_v58, %s1391_s12 }
 0xaae   :  { %v538_v60 = vpop.permute.xlu1 %537 }
 0xaaf   :  { %v540_v61 = vmul.f32 %v1305_v56, %v538_v60 }
 0xab1   :  { %542 = vrot.lane.b32.xlu0 %v540_v61, %s1392_s15 }
 0xb23   :  { %v543_v63 = vpop.permute.xlu0 %542 }
 0xb24   :  { %v545_v24 = vadd.f32 %v543_v63, %v535_v62 }
 0xb26   :  { %1306 = vtanh.f32 %v545_v24 }
 0xb33   :  { %v1307_v0 = vpop.eup %1306 }
 0xb34   :  { %548 = vrot.lane.b32.xlu1 %v1307_v0, %s1391_s12 }
 0xba6   :  { %v549_v1 = vpop.permute.xlu1 %548 }
 0xba7   :  { %v1543_v2 = vmul.f32 %v1305_v56, %v549_v1 }
 0xba9   :  { %v552_v3 = vpack.c.bf16 %v1543_v2, %v1543_v2 }
 0xbab   :  { %554 = vrot.lane.b32.xlu0 %v552_v3, %s1392_s15 }
 0xc1d   :  { %v555_v4 = vpop.permute.xlu0 %554 }
 0xc1e   :  { %1229 = vmatmul.mubr.msk.bf16.vlgmr.msra.gmra.mxu0 %vm259_vm3, %v555_v4 }
 0xc1f   :  { %1241 = vmatpush3.bf16.msra.mxu0 %v1451_v48  ;;  %1244 = vmatprep.mubr.msk.bf16.mxu0 %vm1390_vm2, %v1389_v45 }
 0xc20   :  { %1242 = vmatprep.subr.bf16.mxu0 %v1389_v45 }
 0xc23   :  { %1243 = vmatpush3.bf16.msra.mxu0 %v1457_v51 }
 0xcde   :  { %v593_v5 = vpop.f32.mrf.mxu0 }
 0xcdf   :  { %v599_v6 = vadd.f32 %v593_v5, %v1483_v30 }
 0xce0   :  { %v1230_v7 = vpop.f32.mrf.mxu0 }
 0xce1   :  { %v1072_v8 = vmul.f32 -1.442695, %v599_v6 }
 0xce2   :  { %v596_v9 = vpop.f32.mrf.mxu0 }
 0xce3   :  { %1308 = vpow2.f32 %v1072_v8 }
 0xce4   :  { %v1231_v10 = vpop.f32.mrf.mxu0 }
 0xcf0   :  { %v1309_v11 = vpop.eup %1308 }
 0xcf1   :  { %v603_v12 = vadd.f32 1.0, %v1309_v11 }
 0xcf3   :  { %1310 = vrcp.f32 %v603_v12 }
 0xd00   :  { %v1311_v13 = vpop.eup %1310 }
 0xd01   :  { %v606_v14 = vmul.f32 2.0, %v1311_v13  ;;  %v608_v19 = vmul.f32 %v1311_v13, %v545_v24 }
 0xd03   :  { %v1073_v15 = vadd.f32 -1.0, %v606_v14 }
 0xd05   :  { %610 = vrot.lane.b32.xlu1 %v1073_v15, %s1391_s12 }
 0xd77   :  { %v611_v17 = vpop.permute.xlu1 %610 }
 0xd78   :  { %v613_v18 = vmul.f32 %v1311_v13, %v611_v17 }
 0xd7a   :  { %615 = vrot.lane.b32.xlu0 %v613_v18, %s1392_s15 }
 0xdec   :  { %v616_v20 = vpop.permute.xlu0 %615 }
 0xded   :  { %v618_v30 = vadd.f32 %v616_v20, %v608_v19 }
 0xdef   :  { %1312 = vtanh.f32 %v618_v30 }
 0xdfc   :  { %v1313_v22 = vpop.eup %1312 }
 0xdfd   :  { %621 = vrot.lane.b32.xlu1 %v1313_v22, %s1391_s12 }
 0xe6f   :  { %v622_v23 = vpop.permute.xlu1 %621 }
 0xe70   :  { %v1558_v25 = vmul.f32 %v1311_v13, %v622_v23  ;;  %v75_v23 = vld [vmem:[#allocation3 + $0xe8] sm:$0xff] }
 0xe72   :  { %v625_v26 = vpack.c.bf16 %v1558_v25, %v1558_v25 }
 0xe74   :  { %627 = vrot.lane.b32.xlu0 %v625_v26, %s1392_s15 }
 0xee6   :  { %v628_v27 = vpop.permute.xlu0 %627 }
 0xee7   :  { %1237 = vmatmul.mubr.msk.bf16.vlgmr.msra.gmra.mxu1 %vm259_vm3, %v628_v27 }
 0xee8   :  { %1249 = vmatpush3.bf16.msra.mxu1 %v1451_v48  ;;  %1252 = vmatprep.mubr.msk.bf16.mxu1 %vm1390_vm2, %v1389_v45 }
 0xee9   :  { %1250 = vmatprep.subr.bf16.mxu1 %v1389_v45 }
 0xeec   :  { %1251 = vmatpush3.bf16.msra.mxu1 %v1457_v51 }
 0xfa7   :  { %v666_v29 = vpop.f32.mrf.mxu1 }
 0xfa8   :  { %v672_v31 = vadd.f32 %v666_v29, %v1487_v35 }
 0xfa9   :  { %v1238_v33 = vpop.f32.mrf.mxu1 }
 0xfaa   :  { %v1075_v34 = vmul.f32 -1.442695, %v672_v31  ;;  %v74_v31 = vld [vmem:[#allocation3 + $0xe0] sm:$0xff]  ;;  %v73_v33 = vld [vmem:[#allocation3 + $0xd8] sm:$0xff] }
 0xfab   :  { %v669_v36 = vpop.f32.mrf.mxu1 }
 0xfac   :  { %1314 = vpow2.f32 %v1075_v34 }
 0xfad   :  { %v1239_v37 = vpop.f32.mrf.mxu1 }
 0xfb9   :  { %v1315_v38 = vpop.eup %1314 }
 0xfba   :  { %v676_v39 = vadd.f32 1.0, %v1315_v38 }
 0xfbc   :  { %1316 = vrcp.f32 %v676_v39 }
 0xfc9   :  { %v1317_v21 = vpop.eup %1316 }
 0xfca   :  { %v679_v48 = vmul.f32 2.0, %v1317_v21  ;;  %v681_v51 = vmul.f32 %v1317_v21, %v618_v30 }
 0xfcc   :  { %v1076_v40 = vadd.f32 -1.0, %v679_v48  ;;  %v845_v48 = vstv %s1649_s3 }
 0xfce   :  { %683 = vrot.lane.b32.xlu1 %v1076_v40, %s1391_s12 }
0x1040   :  { %v684_v41 = vpop.permute.xlu1 %683 }
0x1041   :  { %v686_v45 = vmul.f32 %v1317_v21, %v684_v41 }
0x1043   :  { %688 = vrot.lane.b32.xlu0 %v686_v45, %s1392_s15 }
0x10b5   :  { %v689_v43 = vpop.permute.xlu0 %688 }
0x10b6   :  { %v691_v35 = vadd.f32 %v689_v43, %v681_v51 }
0x10b8   :  { %1318 = vtanh.f32 %v691_v35 }
0x10c5   :  { %v1319_v44 = vpop.eup %1318 }
0x10c6   :  { %694 = vrot.lane.b32.xlu1 %v1319_v44, %s1391_s12 }
0x1138   :  { %v695_v46 = vpop.permute.xlu1 %694 }
0x1139   :  { %v1573_v47 = vmul.f32 %v1317_v21, %v695_v46 }
0x113b   :  { %v698_v49 = vpack.c.bf16 %v1573_v47, %v1573_v47 }
0x113d   :  { %700 = vrot.lane.b32.xlu0 %v698_v49, %s1392_s15 }
0x11af   :  { %v701_v50 = vpop.permute.xlu0 %700 }
0x11b0   :  { %1245 = vmatmul.mubr.msk.bf16.vlgmr.msra.gmra.mxu0 %vm259_vm3, %v701_v50 }
0x1270   :  { %v739_v52 = vpop.f32.mrf.mxu0 }
0x1271   :  { %v745_v53 = vadd.f32 %v739_v52, %v1481_v28 }
0x1272   :  { %v1246_v54 = vpop.f32.mrf.mxu0 }
0x1273   :  { %v1078_v55 = vmul.f32 -1.442695, %v745_v53 }
0x1274   :  { %v742_v56 = vpop.f32.mrf.mxu0 }
0x1275   :  { %1320 = vpow2.f32 %v1078_v55 }
0x1276   :  { %v1247_v57 = vpop.f32.mrf.mxu0 }
0x1282   :  { %v1321_v58 = vpop.eup %1320 }
0x1283   :  { %v749_v60 = vadd.f32 1.0, %v1321_v58 }
0x1285   :  { %1322 = vrcp.f32 %v749_v60 }
0x1292   :  { %v1323_v61 = vpop.eup %1322 }
0x1293   :  { %v752_v62 = vmul.f32 2.0, %v1323_v61  ;;  %v754_v1 = vmul.f32 %v1323_v61, %v691_v35 }
0x1295   :  { %v1079_v63 = vadd.f32 -1.0, %v752_v62 }
0x1297   :  { %756 = vrot.lane.b32.xlu1 %v1079_v63, %s1391_s12 }
0x1309   :  { %v757_v24 = vpop.permute.xlu1 %756 }
0x130a   :  { %v759_v0 = vmul.f32 %v1323_v61, %v757_v24 }
0x130c   :  { %761 = vrot.lane.b32.xlu0 %v759_v0, %s1392_s15 }
0x137e   :  { %v762_v3 = vpop.permute.xlu0 %761 }
0x137f   :  { %v764_v28 = vadd.f32 %v762_v3, %v754_v1 }
0x1381   :  { %1324 = vtanh.f32 %v764_v28 }
0x138e   :  { %v1325_v4 = vpop.eup %1324 }
0x138f   :  { %767 = vrot.lane.b32.xlu1 %v1325_v4, %s1391_s12 }
0x1401   :  { %v768_v5 = vpop.permute.xlu1 %767 }
0x1402   :  { %v770_v6 = vmul.f32 %v1323_v61, %v768_v5 }
0x1404   :  { %v771_v7 = vpack.c.bf16 %v770_v6, %v770_v6 }
0x1406   :  { %773 = vrot.lane.b32.xlu0 %v771_v7, %s1392_s15 }
0x1478   :  { %v774_v8 = vpop.permute.xlu0 %773 }
0x1479   :  { %1253 = vmatmul.mubr.msk.bf16.vlgmr.msra.gmra.mxu1 %vm259_vm3, %v774_v8 }
0x1539   :  { %v812_v9 = vpop.f32.mrf.mxu1 }
0x153a   :  { %v818_v10 = vadd.f32 %v812_v9, %v1485_v32  ;;  %v76_v32 = vld [vmem:[#allocation3 + $0xf0] sm:$0xff] }
0x153b   :  { %v1254_v11 = vpop.f32.mrf.mxu1  ;;  %1256 = vmatprep.subr.mxu0 %v76_v32 }
0x153c   :  { %v1081_v12 = vmul.f32 -1.442695, %v818_v10  ;;  %1257 = vmatpush3.msra.mxu0 %v76_v32 }
0x153d   :  { %v815_v13 = vpop.f32.mrf.mxu1  ;;  %1258 = vmatprep.subr.mxu0 %v75_v23 }
0x153e   :  { %1326 = vpow2.f32 %v1081_v12  ;;  %1259 = vmatpush3.msra.mxu0 %v75_v23 }
0x153f   :  { %v1255_v14 = vpop.f32.mrf.mxu1  ;;  %1260 = vmatprep.subr.mxu0 %v74_v31 }
0x1540   :  { %1261 = vmatpush3.msra.mxu0 %v74_v31 }
0x1541   :  { %1262 = vmatprep.subr.mxu0 %v73_v33 }
0x1542   :  { %1263 = vmatpush3.msra.mxu0 %v73_v33 }
0x154b   :  { %v1327_v15 = vpop.eup %1326 }
0x154c   :  { %v822_v17 = vadd.f32 1.0, %v1327_v15 }
0x154e   :  { %1328 = vrcp.f32 %v822_v17 }
0x155b   :  { %v1329_v18 = vpop.eup %1328 }
0x155c   :  { %v825_v19 = vmul.f32 2.0, %v1329_v18  ;;  %v827_v26 = vmul.f32 %v1329_v18, %v764_v28 }
0x155e   :  { %v1082_v20 = vadd.f32 -1.0, %v825_v19 }
0x1560   :  { %829 = vrot.lane.b32.xlu1 %v1082_v20, %s1391_s12 }
0x15d2   :  { %v830_v30 = vpop.permute.xlu1 %829 }
0x15d3   :  { %v832_v22 = vmul.f32 %v1329_v18, %v830_v30 }
0x15d5   :  { %834 = vrot.lane.b32.xlu0 %v832_v22, %s1392_s15 }
0x15d9   :  { %854 = vrot.lane.b32.xlu0 %v1496_v59, %s1392_s15 }
0x15dd   :  { %858 = vrot.lane.b32.xlu0 %v1527_v42, %s1392_s15 }
0x15e1   :  { %862 = vrot.lane.b32.xlu0 %v1558_v25, %s1392_s15 }
0x15e5   :  { %866 = vrot.lane.b32.xlu0 %v770_v6, %s1392_s15 }
0x1647   :  { %v835_v27 = vpop.permute.xlu0 %834 }
0x1648   :  { %v837_v29 = vadd.f32 %v835_v27, %v827_v26 }
0x164a   :  { %1330 = vtanh.f32 %v837_v29 }
0x164b   :  { %v855_v59 = vpop.permute.xlu0 %854 }
0x164c   :  { %1264 = vmatprep.mubr.msk.f32.mxu0 %vm259_vm3, %v855_v59 }
0x164f   :  { %v859_v34 = vpop.permute.xlu0 %858 }
0x1653   :  { %v863_v38 = vpop.permute.xlu0 %862 }
0x1657   :  { %v1331_v42 = vpop.eup %1330 }
0x1658   :  { %840 = vrot.lane.b32.xlu1 %v1331_v42, %s1391_s12 }
0x165c   :  { %856 = vrot.lane.b32.xlu1 %v1511_v16, %s1392_s15 }
0x1660   :  { %860 = vrot.lane.b32.xlu1 %v1543_v2, %s1392_s15  ;;  %v867_v2 = vpop.permute.xlu0 %866 }
0x1664   :  { %864 = vrot.lane.b32.xlu1 %v1573_v47, %s1392_s15 }
0x16ca   :  { %v841_v25 = vpop.permute.xlu1 %840 }
0x16cb   :  { %v843_v36 = vmul.f32 %v1329_v18, %v841_v25 }
0x16cd   :  { %868 = vrot.lane.b32.xlu1 %v843_v36, %s1392_s15 }
0x16ce   :  { %v857_v37 = vpop.permute.xlu1 %856 }
0x16cf   :  { %1265 = vmatmul.mubr.msk.f32.vlgmr.msra.gmra.mxu0 %vm259_vm3, %v857_v37 }
0x16d0   :  { %1267 = vmatprep.mubr.msk.f32.mxu0 %vm259_vm3, %v859_v34 }
0x16d2   :  { %v861_v39 = vpop.permute.xlu1 %860 }
0x16d3   :  { %1268 = vmatmul.mubr.msk.f32.gmra.mxu0 %vm259_vm3, %v861_v39 }
0x16d4   :  { %1270 = vmatprep.mubr.msk.f32.mxu0 %vm259_vm3, %v863_v38 }
0x16d6   :  { %v865_v16 = vpop.permute.xlu1 %864 }
0x16d7   :  { %1271 = vmatmul.mubr.msk.f32.gmra.mxu0 %vm259_vm3, %v865_v16 }
0x16d8   :  { %1273 = vmatprep.mubr.msk.f32.mxu0 %vm259_vm3, %v867_v2 }
0x173f   :  { %v869_v21 = vpop.permute.xlu1 %868 }
0x1740   :  { %1274 = vmatmul.mubr.msk.f32.gmra.mxu0 %vm259_vm3, %v869_v21 }
0x178f   :  { %v1266_v40 = vpop.f32.mrf.mxu0 }
0x1790   :  { %v958_v41 = vadd.f32 %v1266_v40, %v845_v48 }
0x1791   :  { %v952_v45 = vpop.f32.mrf.mxu0 }
0x1792   :  { %v1092_v51 = vmul.f32 -1.442695, %v958_v41  ;;  %v953_v43 = vadd.f32 %v952_v45, %v845_v48 }
0x1793   :  { %v1269_v35 = vpop.f32.mrf.mxu0 }
0x1794   :  { %1332 = vpow2.f32 %v1092_v51  ;;  %v1091_v44 = vmul.f32 -1.442695, %v953_v43  ;;  %v968_v46 = vadd.f32 %v1269_v35, %v845_v48 }
0x1795   :  { %v962_v47 = vpop.f32.mrf.mxu0 }
0x1796   :  { %1334 = vpow2.f32 %v1091_v44  ;;  %v1094_v49 = vmul.f32 -1.442695, %v968_v46  ;;  %v963_v50 = vadd.f32 %v962_v47, %v845_v48 }
0x1797   :  { %v1272_v52 = vpop.f32.mrf.mxu0 }
0x1798   :  { %1336 = vpow2.f32 %v1094_v49  ;;  %v1093_v53 = vmul.f32 -1.442695, %v963_v50  ;;  %v978_v54 = vadd.f32 %v1272_v52, %v845_v48 }
0x1799   :  { %v972_v55 = vpop.f32.mrf.mxu0 }
0x179a   :  { %1338 = vpow2.f32 %v1093_v53  ;;  %v1096_v56 = vmul.f32 -1.442695, %v978_v54  ;;  %v973_v57 = vadd.f32 %v972_v55, %v845_v48 }
0x179c   :  { %1340 = vpow2.f32 %v1096_v56  ;;  %v1095_v58 = vmul.f32 -1.442695, %v973_v57 }
0x179e   :  { %1342 = vpow2.f32 %v1095_v58 }
0x17a1   :  { %v1333_v60 = vpop.eup %1332 }
0x17a2   :  { %v1016_v61 = vadd.f32 1.0, %v1333_v60 }
0x17a3   :  { %v1335_v62 = vpop.eup %1334 }
0x17a4   :  { %1344 = vrcp.f32 %v1016_v61  ;;  %v1015_v63 = vadd.f32 1.0, %v1335_v62 }
0x17a5   :  { %v1337_v24 = vpop.eup %1336 }
0x17a6   :  { %1346 = vrcp.f32 %v1015_v63  ;;  %v1018_v0 = vadd.f32 1.0, %v1337_v24 }
0x17a7   :  { %v1339_v1 = vpop.eup %1338 }
0x17a8   :  { %1348 = vrcp.f32 %v1018_v0  ;;  %v1017_v3 = vadd.f32 1.0, %v1339_v1 }
0x17a9   :  { %v1341_v28 = vpop.eup %1340 }
0x17aa   :  { %1350 = vrcp.f32 %v1017_v3  ;;  %v1020_v4 = vadd.f32 1.0, %v1341_v28 }
0x17ab   :  { %v1343_v5 = vpop.eup %1342 }
0x17ac   :  { %1352 = vrcp.f32 %v1020_v4  ;;  %v1019_v6 = vadd.f32 1.0, %v1343_v5 }
0x17ae   :  { %1354 = vrcp.f32 %v1019_v6 }
0x17b1   :  { %v1345_v7 = vpop.eup %1344 }
0x17b2   :  { %1041 = vst.msk [vmem:[%s1650_s4 + $0x8] sm:$0xff] %vm1039_vm4, %v1345_v7 }
0x17b3   :  { %v1347_v8 = vpop.eup %1346 }
0x17b4   :  { %1040 = vst.msk [vmem:[%s1650_s4] sm:$0xff] %vm1039_vm4, %v1347_v8 }
0x17b5   :  { %v1349_v9 = vpop.eup %1348 }
0x17b6   :  { %1043 = vst.msk [vmem:[%s1650_s4 + $0x18] sm:$0xff] %vm1039_vm4, %v1349_v9 }
0x17b7   :  { %v1351_v10 = vpop.eup %1350 }
0x17b8   :  { %1042 = vst.msk [vmem:[%s1650_s4 + $0x10] sm:$0xff] %vm1039_vm4, %v1351_v10 }
0x17b9   :  { %v1353_v11 = vpop.eup %1352 }
0x17ba   :  { %1045 = vst.msk [vmem:[%s1650_s4 + $0x28] sm:$0xff] %vm1039_vm4, %v1353_v11 }
0x17bb   :  { %v1355_v12 = vpop.eup %1354 }
0x17bc   :  { %1044 = vst.msk [vmem:[%s1650_s4 + $0x20] sm:$0xff] %vm1039_vm4, %v1355_v12 }
0x1800   :  { %v1275_v13 = vpop.f32.mrf.mxu0 }
0x1801   :  { %v988_v14 = vadd.f32 %v1275_v13, %v845_v48 }
0x1802   :  { %v982_v15 = vpop.f32.mrf.mxu0 }
0x1803   :  { %v1098_v17 = vmul.f32 -1.442695, %v988_v14  ;;  %v983_v18 = vadd.f32 %v982_v15, %v845_v48 }
0x1805   :  { %1356 = vpow2.f32 %v1098_v17  ;;  %v1097_v19 = vmul.f32 -1.442695, %v983_v18 }
0x1807   :  { %1358 = vpow2.f32 %v1097_v19 }
0x1812   :  { %v1357_v20 = vpop.eup %1356 }
0x1813   :  { %v1022_v30 = vadd.f32 1.0, %v1357_v20 }
0x1814   :  { %v1359_v22 = vpop.eup %1358 }
0x1815   :  { %1360 = vrcp.f32 %v1022_v30  ;;  %v1021_v32 = vadd.f32 1.0, %v1359_v22 }
0x1817   :  { %1362 = vrcp.f32 %v1021_v32 }
0x1822   :  { %v1361_v23 = vpop.eup %1360 }
0x1823   :  { %1047 = vst.msk [vmem:[%s1650_s4 + $0x38] sm:$0xff] %vm1039_vm4, %v1361_v23 }
0x1824   :  { %v1363_v26 = vpop.eup %1362 }
0x1825   :  { %1046 = vst.msk [vmem:[%s1650_s4 + $0x30] sm:$0xff] %vm1039_vm4, %v1363_v26 }
0x1826   :  { %1052 = vsyncpa [#allocation4], 1 }

</bundles_post_ra>
